<compile_context>
chip_gen: v7x
topology: tpu7x:2x2x1
jax: 0.10.0
libtpu: 0.0.40
codegen_flags: <defaults>
</compile_context>

<pallas_src>
import functools

import jax
import jax.numpy as jnp
import numpy as np
from jax.experimental import pallas as pl
from jax.experimental.pallas import tpu as pltpu

HIDDEN = 96        # logical hidden width (matches the PyTorch module)
HIDDEN_PAD = 128   # zero-padded to a full lane / MXU dimension


def _round_up(v, m):
    return (v + m - 1) // m * m


def _mlp_kernel(x_ref, w1_ref, b1_ref, w2_ref, b2_ref, w3_ref, b3_ref, o_ref):
    # x_ref : (tb, in)   f32   batch tile (batch on sublanes, features on lanes)
    # w1_ref: (H, in)    bf16  fc1 weight (PyTorch (out, in) layout, out padded to H)
    # b1_ref: (H, 1)     f32
    # w2_ref: (H, H)     bf16
    # b2_ref: (H, 1)     f32
    # w3_ref: (H, 1)     f32   fc3 weight as a column (padded rows are zero)
    # b3_ref: (1, 1)     f32   scalar fc3 bias, in SMEM
    # o_ref : (1, 1, tb) f32   one scalar per batch row, batch on lanes (dense store)
    x = x_ref[...].astype(w1_ref.dtype)          # cast to bf16 only at the MXU input

    # fc1: (H, in) @ (in, tb) -> (H, tb).  The .T is the standard transposed-RHS
    # contraction (same pattern as q @ k.T in flash attention) and folds into the
    # MXU matmul -- no data transpose is materialized.
    h1 = jnp.dot(w1_ref[...], x.T, preferred_element_type=jnp.float32)
    h1 = jnp.maximum(h1 + b1_ref[...], 0.0)      # bias + ReLU in f32

    # fc2: (H, H) @ (H, tb) -> (H, tb)
    h2 = jnp.dot(w2_ref[...], h1.astype(w2_ref.dtype),
                 preferred_element_type=jnp.float32)
    h2 = jnp.maximum(h2 + b2_ref[...], 0.0)

    # fc3 (out_features == 1): VPU multiply + cross-sublane reduction instead of an
    # MXU matmul with a 1-wide result; the (1, tb) row is stored lane-dense.
    out = jnp.sum(h2 * w3_ref[...], axis=0, keepdims=True) + b3_ref[0, 0]
    o_ref[...] = out.reshape(o_ref.shape).astype(o_ref.dtype)


@functools.partial(jax.jit, static_argnames=("block_b",))
def dense_net_forward(x, kparams, block_b=2048):
    """x: (B, input_size) float32.  kparams: output of prepare_params()."""
    B, in_features = x.shape
    H = kparams["w1"].shape[0]

    # ---- choose the batch tile ----------------------------------------------
    tb = min(int(block_b), _round_up(B, 128))
    # keep the per-tile working set well inside scoped VMEM
    # (x tile is double-buffered f32; h1/h2 are (H, tb) f32)
    per_row_bytes = 2 * in_features * 4 + 2 * H * 4
    max_tb = max(128, (16 * 1024 * 1024 // per_row_bytes) // 128 * 128)
    tb = min(tb, max_tb)
    # v7x has 2 TensorCores: make sure the 'parallel' axis has >= 2 programs
    # whenever the batch is big enough to split.
    if B > 256 and pl.cdiv(B, tb) < 2:
        tb = min(tb, _round_up(pl.cdiv(B, 2), 128))

    num_tiles = pl.cdiv(B, tb)
    b_pad = num_tiles * tb
    if b_pad != B:
        x = jnp.pad(x, ((0, b_pad - B), (0, 0)))

    def resident(shape):
        # constant block index => fetched once and kept VMEM-resident across the grid
        return pl.BlockSpec(shape, lambda i: (0,) * len(shape))

    out = pl.pallas_call(
        _mlp_kernel,
        out_shape=jax.ShapeDtypeStruct((num_tiles, 1, tb), x.dtype),
        grid_spec=pltpu.PrefetchScalarGridSpec(
            num_scalar_prefetch=0,
            grid=(num_tiles,),
            in_specs=[
                pl.BlockSpec((tb, in_features), lambda i: (i, 0)),   # x batch tile
                resident(kparams["w1"].shape),
                resident(kparams["b1"].shape),
                resident(kparams["w2"].shape),
                resident(kparams["b2"].shape),
                resident(kparams["w3"].shape),
                pl.BlockSpec(memory_space=pltpu.MemorySpace.SMEM),   # b3 scalar
            ],
            out_specs=pl.BlockSpec((1, 1, tb), lambda i: (i, 0, 0)),
        ),
        compiler_params=pltpu.CompilerParams(
            dimension_semantics=("parallel",),
        ),
    )(x, kparams["w1"], kparams["b1"], kparams["w2"], kparams["b2"],
      kparams["w3"], kparams["b3"])

    # (num_tiles, 1, tb) row-major == flat batch order; drop the padded tail rows.
    return out.reshape(b_pad, 1)[:B]


def init_dense_net_params(key, input_size):
    """PyTorch-layout params: w (out, in), b (out,), nn.Linear default U(+-1/sqrt(fan_in))."""
    dims = [(input_size, HIDDEN), (HIDDEN, HIDDEN), (HIDDEN, 1)]
    params = {}
    for idx, (fan_in, fan_out) in enumerate(dims, start=1):
        key, kw, kb = jax.random.split(key, 3)
        bound = 1.0 / np.sqrt(fan_in)
        params[f"w{idx}"] = jax.random.uniform(
            kw, (fan_out, fan_in), jnp.float32, minval=-bound, maxval=bound)
        params[f"b{idx}"] = jax.random.uniform(
            kb, (fan_out,), jnp.float32, minval=-bound, maxval=bound)
    return params


def prepare_params(params, mxu_dtype=jnp.bfloat16):
    """Zero-pad hidden 96 -> 128 (results unchanged) and lay params out for the kernel."""
    H = HIDDEN_PAD
    in_features = params["w1"].shape[1]

    w1 = jnp.zeros((H, in_features), jnp.float32).at[:HIDDEN, :].set(params["w1"])
    b1 = jnp.zeros((H, 1), jnp.float32).at[:HIDDEN, 0].set(params["b1"])
    w2 = jnp.zeros((H, H), jnp.float32).at[:HIDDEN, :HIDDEN].set(params["w2"])
    b2 = jnp.zeros((H, 1), jnp.float32).at[:HIDDEN, 0].set(params["b2"])
    w3 = jnp.zeros((H, 1), jnp.float32).at[:HIDDEN, 0].set(params["w3"][0])
    b3 = params["b3"].reshape(1, 1).astype(jnp.float32)

    return {"w1": w1.astype(mxu_dtype), "b1": b1,
            "w2": w2.astype(mxu_dtype), "b2": b2,
            "w3": w3, "b3": b3}


def _reference_forward(x, params):
    # Pure-JAX f32 reference in PyTorch layout: y = x @ W.T + b
    h1 = jnp.maximum(x @ params["w1"].T + params["b1"], 0.0)
    h2 = jnp.maximum(h1 @ params["w2"].T + params["b2"], 0.0)
    return h2 @ params["w3"].T + params["b3"]


if __name__ == "__main__":
    key = jax.random.PRNGKey(0)
    kx, kp, kx2 = jax.random.split(key, 3)

    input_size = 32
    params = init_dense_net_params(kp, input_size)
    kparams = prepare_params(params)

    # small batch (single tile, batch padded up to the tile)
    x = jax.random.normal(kx, (8, input_size), dtype=jnp.float32)
    out = jax.block_until_ready(dense_net_forward(x, kparams))
    ref = _reference_forward(x, params)
    assert out.shape == (8, 1)
    np.testing.assert_allclose(np.asarray(out), np.asarray(ref), rtol=2e-2, atol=2e-2)

    # multi-tile batch with a ragged tail (exercises tiling + padding path)
    x2 = jax.random.normal(kx2, (300, input_size), dtype=jnp.float32)
    out2 = jax.block_until_ready(dense_net_forward(x2, kparams, block_b=128))
    ref2 = _reference_forward(x2, params)
    assert out2.shape == (300, 1)
    np.testing.assert_allclose(np.asarray(out2), np.asarray(ref2), rtol=2e-2, atol=2e-2)

    print("KERNEL_OK")
</pallas_src>

<mosaic_0001>
module attributes {stable_mosaic.version = 11 : i64} {
  func.func @_mlp_kernel(%arg0: i32, %arg1: memref<128x32xf32, #tpu.memory_space<vmem>>, %arg2: memref<128x32xbf16, #tpu.memory_space<vmem>>, %arg3: memref<128x1xf32, #tpu.memory_space<vmem>>, %arg4: memref<128x128xbf16, #tpu.memory_space<vmem>>, %arg5: memref<128x1xf32, #tpu.memory_space<vmem>>, %arg6: memref<128x1xf32, #tpu.memory_space<vmem>>, %arg7: memref<1x1xf32, #tpu.memory_space<smem>>, %arg8: memref<1x1x128xf32, #tpu.memory_space<vmem>>) attributes {dimension_semantics = [#tpu.dimension_semantics<parallel>], iteration_bounds = array<i64: 1>, scalar_prefetch = 0 : i64, scratch_operands = 0 : i64, tpu.core_type = #tpu.core_type<tc>, window_params = [{transform_indices = @transform_0, window_bounds = array<i64: 128, 32>}, {pipeline_mode = #tpu.pipeline_mode<synchronous>, transform_indices = @transform_1, window_bounds = array<i64: 128, 32>}, {pipeline_mode = #tpu.pipeline_mode<synchronous>, transform_indices = @transform_2, window_bounds = array<i64: 128, 1>}, {pipeline_mode = #tpu.pipeline_mode<synchronous>, transform_indices = @transform_3, window_bounds = array<i64: 128, 128>}, {pipeline_mode = #tpu.pipeline_mode<synchronous>, transform_indices = @transform_4, window_bounds = array<i64: 128, 1>}, {pipeline_mode = #tpu.pipeline_mode<synchronous>, transform_indices = @transform_5, window_bounds = array<i64: 128, 1>}, {transform_indices = @transform_6, window_bounds = array<i64: 1, 1>}, {transform_indices = @transform_7, window_bounds = array<i64: 1, 1, 128>}]} {
    %c0 = arith.constant 0 : index
    %c0_0 = arith.constant 0 : index
    %0 = vector.load %arg1[%c0, %c0_0] : memref<128x32xf32, #tpu.memory_space<vmem>>, vector<128x32xf32>
    %1 = arith.truncf %0 : vector<128x32xf32> to vector<128x32xbf16>
    %c0_1 = arith.constant 0 : index
    %c0_2 = arith.constant 0 : index
    %2 = vector.load %arg2[%c0_1, %c0_2] : memref<128x32xbf16, #tpu.memory_space<vmem>>, vector<128x32xbf16>
    %3 = tpu.transpose %1, [1, 0] : vector<128x32xbf16> -> vector<32x128xbf16>
    %cst = arith.constant dense<0.000000e+00> : vector<128x128xf32>
    %4 = tpu.matmul %2, %3, %cst {dimension_numbers = #tpu.dot_dimension_numbers<[1], [0], [0], [1], [0, 0, 1, 1], [], []>} : vector<128x32xbf16>, vector<32x128xbf16>, vector<128x128xf32> -> vector<128x128xf32>
    %c0_3 = arith.constant 0 : index
    %c0_4 = arith.constant 0 : index
    %5 = vector.load %arg3[%c0_3, %c0_4] : memref<128x1xf32, #tpu.memory_space<vmem>>, vector<128x1xf32>
    %6 = vector.broadcast %5 : vector<128x1xf32> to vector<128x128xf32>
    %7 = arith.addf %4, %6 : vector<128x128xf32>
    %cst_5 = arith.constant 0.000000e+00 : f32
    %8 = vector.broadcast %cst_5 : f32 to vector<128x128xf32>
    %9 = arith.maximumf %7, %8 : vector<128x128xf32>
    %c0_6 = arith.constant 0 : index
    %c0_7 = arith.constant 0 : index
    %10 = vector.load %arg4[%c0_6, %c0_7] : memref<128x128xbf16, #tpu.memory_space<vmem>>, vector<128x128xbf16>
    %11 = arith.truncf %9 : vector<128x128xf32> to vector<128x128xbf16>
    %cst_8 = arith.constant dense<0.000000e+00> : vector<128x128xf32>
    %12 = tpu.matmul %10, %11, %cst_8 {dimension_numbers = #tpu.dot_dimension_numbers<[1], [0], [0], [1], [0, 0, 1, 1], [], []>} : vector<128x128xbf16>, vector<128x128xbf16>, vector<128x128xf32> -> vector<128x128xf32>
    %c0_9 = arith.constant 0 : index
    %c0_10 = arith.constant 0 : index
    %13 = vector.load %arg5[%c0_9, %c0_10] : memref<128x1xf32, #tpu.memory_space<vmem>>, vector<128x1xf32>
    %14 = vector.broadcast %13 : vector<128x1xf32> to vector<128x128xf32>
    %15 = arith.addf %12, %14 : vector<128x128xf32>
    %cst_11 = arith.constant 0.000000e+00 : f32
    %16 = vector.broadcast %cst_11 : f32 to vector<128x128xf32>
    %17 = arith.maximumf %15, %16 : vector<128x128xf32>
    %c0_12 = arith.constant 0 : index
    %c0_13 = arith.constant 0 : index
    %18 = vector.load %arg6[%c0_12, %c0_13] : memref<128x1xf32, #tpu.memory_space<vmem>>, vector<128x1xf32>
    %19 = vector.broadcast %18 : vector<128x1xf32> to vector<128x128xf32>
    %20 = arith.mulf %17, %19 : vector<128x128xf32>
    %cst_14 = arith.constant dense<0.000000e+00> : vector<128xf32>
    %21 = vector.multi_reduction <add>, %20, %cst_14 [0] : vector<128x128xf32> to vector<128xf32>
    %22 = vector.shape_cast %21 : vector<128xf32> to vector<1x128xf32>
    %c0_15 = arith.constant 0 : index
    %c0_16 = arith.constant 0 : index
    %23 = memref.load %arg7[%c0_15, %c0_16] : memref<1x1xf32, #tpu.memory_space<smem>>
    %24 = vector.broadcast %23 : f32 to vector<1x128xf32>
    %25 = arith.addf %22, %24 : vector<1x128xf32>
    %26 = vector.shape_cast %25 : vector<1x128xf32> to vector<1x1x128xf32>
    %c0_17 = arith.constant 0 : index
    %c0_18 = arith.constant 0 : index
    %c0_19 = arith.constant 0 : index
    %27 = vector.load %arg8[%c0_17, %c0_18, %c0_19] : memref<1x1x128xf32, #tpu.memory_space<vmem>>, vector<1x1x128xf32>
    tpu.vector_store %arg8[%c0_17, %c0_18, %c0_19], %26 {strides = array<i32>} : memref<1x1x128xf32, #tpu.memory_space<vmem>>, vector<1x1x128xf32>,
    return
  }
  func.func @transform_0(%arg0: i32) -> (i32, i32) {
    %c0_i32 = arith.constant 0 : i32
    %c0_i32_0 = arith.constant 0 : i32
    return %arg0, %c0_i32 : i32, i32
  }
  func.func @transform_1(%arg0: i32) -> (i32, i32) {
    %c0_i32 = arith.constant 0 : i32
    %c0_i32_0 = arith.constant 0 : i32
    %c0_i32_1 = arith.constant 0 : i32
    return %c0_i32, %c0_i32_0 : i32, i32
  }
  func.func @transform_2(%arg0: i32) -> (i32, i32) {
    %c0_i32 = arith.constant 0 : i32
    %c0_i32_0 = arith.constant 0 : i32
    %c0_i32_1 = arith.constant 0 : i32
    return %c0_i32, %c0_i32_0 : i32, i32
  }
  func.func @transform_3(%arg0: i32) -> (i32, i32) {
    %c0_i32 = arith.constant 0 : i32
    %c0_i32_0 = arith.constant 0 : i32
    %c0_i32_1 = arith.constant 0 : i32
    return %c0_i32, %c0_i32_0 : i32, i32
  }
  func.func @transform_4(%arg0: i32) -> (i32, i32) {
    %c0_i32 = arith.constant 0 : i32
    %c0_i32_0 = arith.constant 0 : i32
    %c0_i32_1 = arith.constant 0 : i32
    return %c0_i32, %c0_i32_0 : i32, i32
  }
  func.func @transform_5(%arg0: i32) -> (i32, i32) {
    %c0_i32 = arith.constant 0 : i32
    %c0_i32_0 = arith.constant 0 : i32
    %c0_i32_1 = arith.constant 0 : i32
    return %c0_i32, %c0_i32_0 : i32, i32
  }
  func.func @transform_6(%arg0: i32) -> (i32, i32) {
    %c0_i32 = arith.constant 0 : i32
    %c0_i32_0 = arith.constant 0 : i32
    %c0_i32_1 = arith.constant 0 : i32
    return %c0_i32, %c0_i32_0 : i32, i32
  }
  func.func @transform_7(%arg0: i32) -> (i32, i32, i32) {
    %c0_i32 = arith.constant 0 : i32
    %c0_i32_0 = arith.constant 0 : i32
    %c0_i32_1 = arith.constant 0 : i32
    return %arg0, %c0_i32, %c0_i32_0 : i32, i32, i32
  }
}

</mosaic_0001>

<bundles_post_ra>
// kernel: dense_net_forward.1
= control target key start
LH: loop header
LB: loop body
LE: loop exit
PB: predicated region body
PF: predicated region fallthrough
CT: control target
= control target key end

     0   :  { %vm204_vm0 = vcmask 261120   ;;  %v935_v3 = vmov 0   ;;  %s1246_s0 = inlined_call_operand.vmem [shape: f32[128,32], index: 0, kind: input, shape index: {}]   ;;  %s1247_s2 = inlined_call_operand.vmem [shape: f32[128,1], index: 2, kind: input, shape index: {}]   ;;  %s1248_s1 = inlined_call_operand.vmem [shape: bf16[128,32], index: 1, kind: input, shape index: {}]   ;;  %s1249_s4 = inlined_call_operand.vmem [shape: f32[128,1], index: 4, kind: input, shape index: {}]   ;;  %s1250_s5 = inlined_call_operand.vmem [shape: f32[128,1], index: 5, kind: input, shape index: {}]   ;;  %s1251_s3 = inlined_call_operand.vmem [shape: bf16[128,128], index: 3, kind: input, shape index: {}]   ;;  %s1252_s6 = inlined_call_operand.<no memory space> [shape: f32[1,1], index: 6, kind: input, shape index: {}]   ;;  %s1253_s7 = inlined_call_operand.vmem [shape: f32[1,1,128], index: 7, kind: output, shape index: {}]  }
   0x1   :  { %v28_v0 = vld [vmem:[%s1246_s0] sm:$0xff]  ;;  %v29_v1 = vld [vmem:[%s1246_s0 + $0x8] sm:$0xff]  ;;  %v30_v2 = vld [vmem:[%s1246_s0 + $0x10] sm:$0xff]  ;;  %917 = vset.pattern.permute.xlu0 %v935_v3  ;;  %918 = vset.pattern.permute.xlu1 %v935_v3 }
   0x2   :  { %v44_v4 = vpack.c.bf16 %v29_v1, %v28_v0  ;;  %v31_v5 = vld [vmem:[%s1246_s0 + $0x18] sm:$0xff]  ;;  %v68_v8 = vld [vmem:[%s1247_s2] sm:$0xff]  ;;  %v70_v10 = vld [vmem:[%s1247_s2 + $0x10] sm:$0xff] }
   0x3   :  { %v45_v6 = vpack.c.bf16 %v31_v5, %v30_v2  ;;  %v32_v9 = vld [vmem:[%s1246_s0 + $0x20] sm:$0xff]  ;;  %86 = vperm.xlu0 %917, %v68_v8   ;;  %v33_v11 = vld [vmem:[%s1246_s0 + $0x28] sm:$0xff]  ;;  %96 = vperm.xlu1 %918, %v70_v10   ;;  %v71_v13 = vld [vmem:[%s1247_s2 + $0x18] sm:$0xff] }
   0x4   :  { %908 = vmatprep.subr.msk.bf16.mxu0 %vm204_vm0, %v44_v4  ;;  %v230_v7 = vsel %vm204_vm0, %v44_v4, 0  ;;  %v69_v12 = vld [vmem:[%s1247_s2 + $0x8] sm:$0xff]  ;;  %v919_v14 = vld [vmem:[%s1248_s1] sm:$0xff]   ;;  %v46_v16 = vpack.c.bf16 %v33_v11, %v32_v9  ;;  %v34_v19 = vld [vmem:[%s1246_s0 + $0x30] sm:$0xff] }
   0x5   :  { %845 = vmatpush3.bf16.xpose.msra.mxu0 %v230_v7  ;;  %v233_v15 = vsel %vm204_vm0, %v45_v6, 0  ;;  %860 = vmatprep.mubr.msk.bf16.mxu0 %vm204_vm0, %v919_v14  ;;  %v72_v17 = vld [vmem:[%s1247_s2 + $0x20] sm:$0xff]  ;;  %v73_v18 = vld [vmem:[%s1247_s2 + $0x28] sm:$0xff]  ;;  %v35_v20 = vld [vmem:[%s1246_s0 + $0x38] sm:$0xff] }
   0x6   :  { %909 = vmatprep.subr.msk.bf16.mxu0 %vm204_vm0, %v45_v6  ;;  %v74_v21 = vld [vmem:[%s1247_s2 + $0x30] sm:$0xff]  ;;  %v75_v22 = vld [vmem:[%s1247_s2 + $0x38] sm:$0xff]  ;;  %v236_v23 = vsel %vm204_vm0, %v46_v16, 0  ;;  %v47_v24 = vpack.c.bf16 %v35_v20, %v34_v19  ;;  %v76_v25 = vld [vmem:[%s1247_s2 + $0x40] sm:$0xff] }
   0x7   :  { %91 = vperm.xlu0 %917, %v69_v12   ;;  %101 = vperm.xlu1 %918, %v71_v13   ;;  %v77_v26 = vld [vmem:[%s1247_s2 + $0x48] sm:$0xff]  ;;  %v36_v27 = vld [vmem:[%s1246_s0 + $0x40] sm:$0xff]  ;;  %v78_v29 = vld [vmem:[%s1247_s2 + $0x50] sm:$0xff] }
   0x8   :  { %v37_v28 = vld [vmem:[%s1246_s0 + $0x48] sm:$0xff]  ;;  %v79_v30 = vld [vmem:[%s1247_s2 + $0x58] sm:$0xff]  ;;  %v239_v31 = vsel %vm204_vm0, %v47_v24, 0  ;;  %v80_v33 = vld [vmem:[%s1247_s2 + $0x60] sm:$0xff] }
   0x9   :  { %v48_v32 = vpack.c.bf16 %v37_v28, %v36_v27  ;;  %v81_v34 = vld [vmem:[%s1247_s2 + $0x68] sm:$0xff]  ;;  %v38_v35 = vld [vmem:[%s1246_s0 + $0x50] sm:$0xff]  ;;  %v39_v36 = vld [vmem:[%s1246_s0 + $0x58] sm:$0xff] }
   0xa   :  { %v82_v37 = vld [vmem:[%s1247_s2 + $0x70] sm:$0xff]  ;;  %v83_v38 = vld [vmem:[%s1247_s2 + $0x78] sm:$0xff]  ;;  %v49_v40 = vpack.c.bf16 %v39_v36, %v38_v35  ;;  %v390_v41 = vld [vmem:[%s1249_s4] sm:$0xff] }
   0xb   :  { %106 = vperm.xlu0 %917, %v72_v17   ;;  %111 = vperm.xlu1 %918, %v73_v18   ;;  %v242_v39 = vsel %vm204_vm0, %v48_v32, 0  ;;  %v391_v42 = vld [vmem:[%s1249_s4 + $0x8] sm:$0xff]  ;;  %v40_v43 = vld [vmem:[%s1246_s0 + $0x60] sm:$0xff]  ;;  %v392_v45 = vld [vmem:[%s1249_s4 + $0x10] sm:$0xff] }
   0xc   :  { %v41_v44 = vld [vmem:[%s1246_s0 + $0x68] sm:$0xff]  ;;  %v393_v46 = vld [vmem:[%s1249_s4 + $0x18] sm:$0xff]  ;;  %v245_v47 = vsel %vm204_vm0, %v49_v40, 0  ;;  %v394_v49 = vld [vmem:[%s1249_s4 + $0x20] sm:$0xff] }
   0xd   :  { %847 = vmatpush3.bf16.xpose.msra.mxu0 %v233_v15  ;;  %v50_v48 = vpack.c.bf16 %v41_v44, %v40_v43  ;;  %v647_v50 = vld [vmem:[%s1250_s5] sm:$0xff]  ;;  %v42_v51 = vld [vmem:[%s1246_s0 + $0x70] sm:$0xff]  ;;  %v43_v52 = vld [vmem:[%s1246_s0 + $0x78] sm:$0xff] }
   0xe   :  { %910 = vmatprep.subr.msk.bf16.mxu0 %vm204_vm0, %v46_v16  ;;  %v648_v53 = vld [vmem:[%s1250_s5 + $0x8] sm:$0xff]  ;;  %v649_v54 = vld [vmem:[%s1250_s5 + $0x10] sm:$0xff]  ;;  %v51_v56 = vpack.c.bf16 %v43_v52, %v42_v51  ;;  %v650_v58 = vld [vmem:[%s1250_s5 + $0x18] sm:$0xff] }
   0xf   :  { %116 = vperm.xlu0 %917, %v74_v21   ;;  %121 = vperm.xlu1 %918, %v75_v22   ;;  %v248_v55 = vsel %vm204_vm0, %v50_v48, 0  ;;  %v395_v57 = vld [vmem:[%s1249_s4 + $0x28] sm:$0xff]  ;;  %v396_v59 = vld [vmem:[%s1249_s4 + $0x30] sm:$0xff]  ;;  %v651_v60 = vld [vmem:[%s1250_s5 + $0x20] sm:$0xff] }
  0x10   :  { %v251_v61 = vsel %vm204_vm0, %v51_v56, 0  ;;  %v397_v62 = vld [vmem:[%s1249_s4 + $0x38] sm:$0xff]  ;;  %v652_v63 = vld [vmem:[%s1250_s5 + $0x28] sm:$0xff]  ;;  %v398_v0 = vld [vmem:[%s1249_s4 + $0x40] sm:$0xff] }
  0x11   :  { %v920_v1 = vld [vmem:[%s1248_s1 + $0x8] sm:$0xff]   ;;  %v653_v2 = vld [vmem:[%s1250_s5 + $0x30] sm:$0xff]  ;;  %v654_v5 = vld [vmem:[%s1250_s5 + $0x38] sm:$0xff] }
  0x12   :  { %v921_v3 = vld [vmem:[%s1248_s1 + $0x10] sm:$0xff]   ;;  %v399_v4 = vld [vmem:[%s1249_s4 + $0x48] sm:$0xff]  ;;  %v922_v7 = vld [vmem:[%s1248_s1 + $0x18] sm:$0xff]  }
  0x13   :  { %126 = vperm.xlu0 %917, %v76_v25   ;;  %131 = vperm.xlu1 %918, %v77_v26   ;;  %v400_v6 = vld [vmem:[%s1249_s4 + $0x50] sm:$0xff]  ;;  %v655_v8 = vld [vmem:[%s1250_s5 + $0x40] sm:$0xff]  ;;  %v401_v10 = vld [vmem:[%s1249_s4 + $0x58] sm:$0xff] }
  0x14   :  { %v923_v9 = vld [vmem:[%s1248_s1 + $0x20] sm:$0xff]   ;;  %v656_v11 = vld [vmem:[%s1250_s5 + $0x48] sm:$0xff]  ;;  %v657_v14 = vld [vmem:[%s1250_s5 + $0x50] sm:$0xff] }
  0x15   :  { %849 = vmatpush3.bf16.xpose.msra.mxu0 %v236_v23  ;;  %v402_v12 = vld [vmem:[%s1249_s4 + $0x60] sm:$0xff]  ;;  %v924_v13 = vld [vmem:[%s1248_s1 + $0x28] sm:$0xff]   ;;  %v925_v15 = vld [vmem:[%s1248_s1 + $0x30] sm:$0xff]  }
  0x16   :  { %911 = vmatprep.subr.msk.bf16.mxu0 %vm204_vm0, %v47_v24  ;;  %v403_v16 = vld [vmem:[%s1249_s4 + $0x68] sm:$0xff]  ;;  %v658_v17 = vld [vmem:[%s1250_s5 + $0x58] sm:$0xff]  ;;  %v404_v18 = vld [vmem:[%s1249_s4 + $0x70] sm:$0xff] }
  0x17   :  { %136 = vperm.xlu0 %917, %v78_v29   ;;  %141 = vperm.xlu1 %918, %v79_v30   ;;  %v926_v19 = vld [vmem:[%s1248_s1 + $0x38] sm:$0xff]   ;;  %v659_v20 = vld [vmem:[%s1250_s5 + $0x60] sm:$0xff]  ;;  %v660_v22 = vld [vmem:[%s1250_s5 + $0x68] sm:$0xff] }
  0x18   :  { %v405_v21 = vld [vmem:[%s1249_s4 + $0x78] sm:$0xff]  ;;  %v661_v23 = vld [vmem:[%s1250_s5 + $0x70] sm:$0xff]  ;;  %v927_v25 = vld [vmem:[%s1251_s3] sm:$0xff]  }
  0x19   :  { %v662_v24 = vld [vmem:[%s1250_s5 + $0x78] sm:$0xff]  ;;  %892 = vmatprep.mubr.bf16.mxu1 %v927_v25 }
  0x1b   :  { %146 = vperm.xlu0 %917, %v80_v33   ;;  %151 = vperm.xlu1 %918, %v81_v34  }
  0x1d   :  { %851 = vmatpush3.bf16.xpose.msra.mxu0 %v239_v31 }
  0x1e   :  { %912 = vmatprep.subr.msk.bf16.mxu0 %vm204_vm0, %v48_v32 }
  0x1f   :  { %156 = vperm.xlu0 %917, %v82_v37   ;;  %161 = vperm.xlu1 %918, %v83_v38  }
  0x23   :  { %408 = vperm.xlu0 %917, %v390_v41   ;;  %413 = vperm.xlu1 %918, %v391_v42  }
  0x25   :  { %853 = vmatpush3.bf16.xpose.msra.mxu0 %v242_v39 }
  0x26   :  { %913 = vmatprep.subr.msk.bf16.mxu0 %vm204_vm0, %v49_v40 }
  0x27   :  { %418 = vperm.xlu0 %917, %v392_v45   ;;  %423 = vperm.xlu1 %918, %v393_v46  }
  0x2b   :  { %428 = vperm.xlu0 %917, %v394_v49   ;;  %665 = vperm.xlu1 %918, %v647_v50  }
  0x2d   :  { %855 = vmatpush3.bf16.xpose.msra.mxu0 %v245_v47 }
  0x2e   :  { %914 = vmatprep.subr.msk.bf16.mxu0 %vm204_vm0, %v50_v48 }
  0x2f   :  { %670 = vperm.xlu0 %917, %v648_v53   ;;  %675 = vperm.xlu1 %918, %v649_v54  }
  0x33   :  { %433 = vperm.xlu0 %917, %v395_v57   ;;  %680 = vperm.xlu1 %918, %v650_v58  }
  0x35   :  { %857 = vmatpush3.bf16.xpose.msra.mxu0 %v248_v55 }
  0x36   :  { %915 = vmatprep.subr.msk.bf16.mxu0 %vm204_vm0, %v51_v56 }
  0x37   :  { %438 = vperm.xlu0 %917, %v396_v59   ;;  %685 = vperm.xlu1 %918, %v651_v60  }
  0x3b   :  { %443 = vperm.xlu0 %917, %v397_v62   ;;  %690 = vperm.xlu1 %918, %v652_v63  }
  0x3d   :  { %859 = vmatpush3.bf16.xpose.msra.mxu0 %v251_v61 }
  0x3f   :  { %448 = vperm.xlu0 %917, %v398_v0   ;;  %695 = vperm.xlu1 %918, %v653_v2  }
  0x43   :  { %453 = vperm.xlu0 %917, %v399_v4   ;;  %700 = vperm.xlu1 %918, %v654_v5  }
  0x44   :  { %861 = vmatmul.mubr.msk.bf16.vlgmr.msra.gmra.mrb[0].mxu0 %vm204_vm0, %v920_v1 }
  0x45   :  { %864 = vmatprep.mubr.msk.bf16.mxu0 %vm204_vm0, %v921_v3 }
  0x47   :  { %458 = vperm.xlu0 %917, %v400_v6   ;;  %705 = vperm.xlu1 %918, %v655_v8  }
  0x4b   :  { %463 = vperm.xlu0 %917, %v401_v10   ;;  %710 = vperm.xlu1 %918, %v656_v11  }
  0x4c   :  { %865 = vmatmul.mubr.msk.bf16.gmra.mrb[4].mxu0 %vm204_vm0, %v922_v7 }
  0x4d   :  { %868 = vmatprep.mubr.msk.bf16.mxu0 %vm204_vm0, %v923_v9 }
  0x4f   :  { %468 = vperm.xlu0 %917, %v402_v12   ;;  %715 = vperm.xlu1 %918, %v657_v14  }
  0x53   :  { %473 = vperm.xlu0 %917, %v403_v16   ;;  %720 = vperm.xlu1 %918, %v658_v17  }
  0x54   :  { %869 = vmatmul.mubr.msk.bf16.gmra.mrb[8].mxu0 %vm204_vm0, %v924_v13 }
  0x55   :  { %872 = vmatprep.mubr.msk.bf16.mxu0 %vm204_vm0, %v925_v15 }
  0x57   :  { %478 = vperm.xlu0 %917, %v404_v18   ;;  %725 = vperm.xlu1 %918, %v659_v20  }
  0x5b   :  { %483 = vperm.xlu0 %917, %v405_v21   ;;  %730 = vperm.xlu1 %918, %v660_v22  }
  0x5c   :  { %873 = vmatmul.mubr.msk.bf16.gmra.mrb[12].mxu0 %vm204_vm0, %v926_v19 }
  0x5f   :  { %735 = vperm.xlu0 %917, %v661_v23   ;;  %740 = vperm.xlu1 %918, %v662_v24  }
  0x82   :  { %v87_v26 = vpop.permute.xlu0 %86  ;;  %v97_v27 = vpop.permute.xlu1 %96 }
  0x86   :  { %v92_v28 = vpop.permute.xlu0 %91  ;;  %v102_v29 = vpop.permute.xlu1 %101 }
  0x8a   :  { %v107_v30 = vpop.permute.xlu0 %106  ;;  %v112_v31 = vpop.permute.xlu1 %111 }
  0x8e   :  { %v117_v32 = vpop.permute.xlu0 %116  ;;  %v122_v36 = vpop.permute.xlu1 %121 }
  0x92   :  { %v127_v44 = vpop.permute.xlu0 %126  ;;  %v132_v48 = vpop.permute.xlu1 %131 }
  0x96   :  { %v137_v57 = vpop.permute.xlu0 %136  ;;  %v142_v61 = vpop.permute.xlu1 %141 }
  0x9a   :  { %v147_v5 = vpop.permute.xlu0 %146  ;;  %v152_v10 = vpop.permute.xlu1 %151 }
  0x9e   :  { %v157_v17 = vpop.permute.xlu0 %156  ;;  %v162_v22 = vpop.permute.xlu1 %161 }
 0x117   :  { %v862_v33 = vpop.f32.mrb[0].mxu0 }
 0x118   :  { %v296_v34 = vadd.f32 %v862_v33, %v97_v27  ;;  %v287_v35 = vpop.f32.mrb[1].mxu0 }
 0x119   :  { %v288_v37 = vadd.f32 %v287_v35, %v87_v26  ;;  %v863_v38 = vpop.f32.mrb[2].mxu0  ;;  %v929_v35 = vld [vmem:[%s1251_s3 + $0x10] sm:$0xff]  }
 0x11a   :  { %v299_v39 = vadd.f32 %v863_v38, %v102_v29  ;;  %v290_v40 = vpop.f32.mrb[3].mxu0  ;;  %v352_v42 = vmax.f32 %v296_v34, 0.0  ;;  %v928_v34 = vld [vmem:[%s1251_s3 + $0x8] sm:$0xff]  }
 0x11b   :  { %v291_v41 = vadd.f32 %v290_v40, %v92_v28  ;;  %v350_v45 = vmax.f32 %v288_v37, 0.0  ;;  %v931_v37 = vld [vmem:[%s1251_s3 + $0x20] sm:$0xff]   ;;  %v932_v38 = vld [vmem:[%s1251_s3 + $0x28] sm:$0xff]   ;;  %v934_v40 = vld [vmem:[%s1251_s3 + $0x38] sm:$0xff]  }
 0x11c   :  { %v353_v43 = vmax.f32 %v299_v39, 0.0  ;;  %v933_v39 = vld [vmem:[%s1251_s3 + $0x30] sm:$0xff]  }
 0x11d   :  { %v351_v46 = vmax.f32 %v291_v41, 0.0  ;;  %v409_v41 = vpop.permute.xlu0 %408 }
 0x11e   :  { %v383_v47 = vpack.c.bf16 %v353_v43, %v352_v42  ;;  %v414_v42 = vpop.permute.xlu1 %413 }
 0x11f   :  { %v866_v49 = vpop.f32.mrb[4].mxu0  ;;  %v382_v50 = vpack.c.bf16 %v351_v46, %v350_v45 }
 0x120   :  { %v312_v51 = vadd.f32 %v866_v49, %v117_v32  ;;  %v303_v52 = vpop.f32.mrb[5].mxu0 }
 0x121   :  { %v304_v53 = vadd.f32 %v303_v52, %v107_v30  ;;  %v867_v54 = vpop.f32.mrb[6].mxu0  ;;  %876 = vmatprep.subr.bf16.mxu1 %v382_v50  ;;  %v419_v43 = vpop.permute.xlu0 %418 }
 0x122   :  { %v315_v55 = vadd.f32 %v867_v54, %v122_v36  ;;  %v306_v56 = vpop.f32.mrb[7].mxu0  ;;  %877 = vmatpush3.bf16.msra.mxu1 %v382_v50  ;;  %v356_v59 = vmax.f32 %v312_v51, 0.0  ;;  %v930_v36 = vld [vmem:[%s1251_s3 + $0x18] sm:$0xff]  }
 0x123   :  { %v307_v58 = vadd.f32 %v306_v56, %v112_v31  ;;  %878 = vmatprep.subr.bf16.mxu1 %v383_v47  ;;  %v354_v62 = vmax.f32 %v304_v53, 0.0 }
 0x124   :  { %v357_v60 = vmax.f32 %v315_v55, 0.0 }
 0x125   :  { %v355_v63 = vmax.f32 %v307_v58, 0.0  ;;  %v429_v45 = vpop.permute.xlu0 %428 }
 0x126   :  { %v385_v0 = vpack.c.bf16 %v357_v60, %v356_v59  ;;  %879 = vmatpush3.bf16.msra.mxu1 %v383_v47 }
 0x127   :  { %v384_v1 = vpack.c.bf16 %v355_v63, %v354_v62  ;;  %v870_v2 = vpop.f32.mrb[8].mxu0 }
 0x128   :  { %v328_v3 = vadd.f32 %v870_v2, %v137_v57  ;;  %v319_v4 = vpop.f32.mrb[9].mxu0 }
 0x129   :  { %v320_v6 = vadd.f32 %v319_v4, %v127_v44  ;;  %v871_v7 = vpop.f32.mrb[10].mxu0  ;;  %880 = vmatprep.subr.bf16.mxu1 %v384_v1  ;;  %v424_v44 = vpop.permute.xlu1 %423 }
 0x12a   :  { %v331_v8 = vadd.f32 %v871_v7, %v142_v61  ;;  %v322_v9 = vpop.f32.mrb[11].mxu0  ;;  %881 = vmatpush3.bf16.msra.mxu1 %v384_v1  ;;  %v360_v12 = vmax.f32 %v328_v3, 0.0  ;;  %v671_v47 = vpop.permute.xlu0 %670 }
 0x12b   :  { %v323_v11 = vadd.f32 %v322_v9, %v132_v48  ;;  %882 = vmatprep.subr.bf16.mxu1 %v385_v0  ;;  %v358_v14 = vmax.f32 %v320_v6, 0.0 }
 0x12c   :  { %v361_v13 = vmax.f32 %v331_v8, 0.0 }
 0x12d   :  { %v359_v15 = vmax.f32 %v323_v11, 0.0  ;;  %v666_v46 = vpop.permute.xlu1 %665 }
 0x12e   :  { %v387_v16 = vpack.c.bf16 %v361_v13, %v360_v12  ;;  %883 = vmatpush3.bf16.msra.mxu1 %v385_v0  ;;  %v434_v49 = vpop.permute.xlu0 %433 }
 0x12f   :  { %v386_v18 = vpack.c.bf16 %v359_v15, %v358_v14  ;;  %v874_v19 = vpop.f32.mrb[12].mxu0 }
 0x130   :  { %v344_v20 = vadd.f32 %v874_v19, %v157_v17  ;;  %v335_v21 = vpop.f32.mrb[13].mxu0 }
 0x131   :  { %v336_v23 = vadd.f32 %v335_v21, %v147_v5  ;;  %v875_v24 = vpop.f32.mrb[14].mxu0  ;;  %884 = vmatprep.subr.bf16.mxu1 %v386_v18  ;;  %v676_v48 = vpop.permute.xlu1 %675 }
 0x132   :  { %v347_v25 = vadd.f32 %v875_v24, %v162_v22  ;;  %v338_v26 = vpop.f32.mrb[15].mxu0  ;;  %885 = vmatpush3.bf16.msra.mxu1 %v386_v18  ;;  %v364_v28 = vmax.f32 %v344_v20, 0.0  ;;  %v439_v51 = vpop.permute.xlu0 %438 }
 0x133   :  { %v339_v27 = vadd.f32 %v338_v26, %v152_v10  ;;  %886 = vmatprep.subr.bf16.mxu1 %v387_v16  ;;  %v362_v30 = vmax.f32 %v336_v23, 0.0 }
 0x134   :  { %v365_v29 = vmax.f32 %v347_v25, 0.0 }
 0x135   :  { %v363_v31 = vmax.f32 %v339_v27, 0.0  ;;  %v681_v50 = vpop.permute.xlu1 %680 }
 0x136   :  { %v389_v32 = vpack.c.bf16 %v365_v29, %v364_v28  ;;  %887 = vmatpush3.bf16.msra.mxu1 %v387_v16  ;;  %v444_v53 = vpop.permute.xlu0 %443 }
 0x137   :  { %v388_v33 = vpack.c.bf16 %v363_v31, %v362_v30 }
 0x139   :  { %888 = vmatprep.subr.bf16.mxu1 %v388_v33  ;;  %v686_v52 = vpop.permute.xlu1 %685 }
 0x13a   :  { %889 = vmatpush3.bf16.msra.mxu1 %v388_v33  ;;  %v449_v55 = vpop.permute.xlu0 %448 }
 0x13b   :  { %890 = vmatprep.subr.bf16.mxu1 %v389_v32 }
 0x13d   :  { %v691_v54 = vpop.permute.xlu1 %690 }
 0x13e   :  { %891 = vmatpush3.bf16.msra.mxu1 %v389_v32  ;;  %v454_v57 = vpop.permute.xlu0 %453 }
 0x141   :  { %893 = vmatmul.mubr.bf16.vlgmr.msra.gmra.mrb[0].mxu1 %v928_v34  ;;  %v696_v56 = vpop.permute.xlu1 %695 }
 0x142   :  { %896 = vmatprep.mubr.bf16.mxu1 %v929_v35  ;;  %v459_v59 = vpop.permute.xlu0 %458 }
 0x145   :  { %v701_v58 = vpop.permute.xlu1 %700 }
 0x146   :  { %v464_v2 = vpop.permute.xlu0 %463 }
 0x149   :  { %897 = vmatmul.mubr.bf16.gmra.mrb[4].mxu1 %v930_v36  ;;  %v706_v60 = vpop.permute.xlu1 %705 }
 0x14a   :  { %900 = vmatprep.mubr.bf16.mxu1 %v931_v37  ;;  %v469_v14 = vpop.permute.xlu0 %468 }
 0x14d   :  { %v711_v7 = vpop.permute.xlu1 %710 }
 0x14e   :  { %v474_v32 = vpop.permute.xlu0 %473 }
 0x151   :  { %901 = vmatmul.mubr.bf16.gmra.mrb[8].mxu1 %v932_v38  ;;  %v716_v21 = vpop.permute.xlu1 %715 }
 0x152   :  { %904 = vmatprep.mubr.bf16.mxu1 %v933_v39 }
 0x155   :  { %v721_v37 = vpop.permute.xlu1 %720 }
 0x159   :  { %905 = vmatmul.mubr.bf16.gmra.mrb[12].mxu1 %v934_v40 }
 0x214   :  { %v894_v61 = vpop.f32.mrb[0].mxu1 }
 0x215   :  { %v568_v62 = vpop.f32.mrb[1].mxu1  ;;  %v577_v63 = vadd.f32 %v894_v61, %v419_v43 }
 0x216   :  { %v569_v0 = vadd.f32 %v568_v62, %v409_v41  ;;  %v895_v1 = vpop.f32.mrb[2].mxu1 }
 0x217   :  { %v580_v3 = vadd.f32 %v895_v1, %v424_v44  ;;  %v571_v4 = vpop.f32.mrb[3].mxu1  ;;  %v633_v8 = vmax.f32 %v577_v63, 0.0 }
 0x218   :  { %v631_v5 = vmax.f32 %v569_v0, 0.0  ;;  %v572_v6 = vadd.f32 %v571_v4, %v414_v42 }
 0x219   :  { %v634_v10 = vmax.f32 %v580_v3, 0.0  ;;  %v745_v16 = vmul.f32 %v676_v48, %v633_v8 }
 0x21a   :  { %v632_v9 = vmax.f32 %v572_v6, 0.0  ;;  %v743_v11 = vmul.f32 %v666_v46, %v631_v5 }
 0x21b   :  { %v746_v22 = vmul.f32 %v681_v50, %v634_v10  ;;  %v479_v50 = vpop.permute.xlu0 %478 }
 0x21c   :  { %v744_v12 = vmul.f32 %v671_v47, %v632_v9  ;;  %v898_v13 = vpop.f32.mrb[4].mxu1 }
 0x21d   :  { %v584_v15 = vpop.f32.mrb[5].mxu1  ;;  %v593_v18 = vadd.f32 %v898_v13, %v439_v51 }
 0x21e   :  { %v759_v17 = vadd.f32 %v744_v12, %v743_v11  ;;  %v585_v19 = vadd.f32 %v584_v15, %v429_v45  ;;  %v899_v20 = vpop.f32.mrb[6].mxu1 }
 0x21f   :  { %v587_v23 = vpop.f32.mrb[7].mxu1  ;;  %v596_v26 = vadd.f32 %v899_v20, %v444_v53  ;;  %v637_v28 = vmax.f32 %v593_v18, 0.0 }
 0x220   :  { %v760_v24 = vadd.f32 %v759_v17, %v745_v16  ;;  %v635_v25 = vmax.f32 %v585_v19, 0.0  ;;  %v588_v27 = vadd.f32 %v587_v23, %v434_v49 }
 0x221   :  { %v638_v34 = vmax.f32 %v596_v26, 0.0  ;;  %v749_v39 = vmul.f32 %v696_v56, %v637_v28 }
 0x222   :  { %v747_v29 = vmul.f32 %v686_v52, %v635_v25  ;;  %v761_v30 = vadd.f32 %v760_v24, %v746_v22  ;;  %v636_v31 = vmax.f32 %v588_v27, 0.0 }
 0x223   :  { %v750_v46 = vmul.f32 %v701_v58, %v638_v34  ;;  %v484_v58 = vpop.permute.xlu0 %483 }
 0x224   :  { %v762_v33 = vadd.f32 %v761_v30, %v747_v29  ;;  %v748_v35 = vmul.f32 %v691_v54, %v636_v31  ;;  %v902_v36 = vpop.f32.mrb[8].mxu1  ;;  %v726_v54 = vpop.permute.xlu1 %725  ;;  %v781_v29 = vstv %s1252_s6 }
 0x225   :  { %v600_v38 = vpop.f32.mrb[9].mxu1  ;;  %v609_v41 = vadd.f32 %v902_v36, %v459_v59 }
 0x226   :  { %v763_v40 = vadd.f32 %v762_v33, %v748_v35  ;;  %v601_v42 = vadd.f32 %v600_v38, %v449_v55  ;;  %v903_v43 = vpop.f32.mrb[10].mxu1 }
 0x227   :  { %v612_v44 = vadd.f32 %v903_v43, %v464_v2  ;;  %v603_v45 = vpop.f32.mrb[11].mxu1  ;;  %v641_v51 = vmax.f32 %v609_v41, 0.0  ;;  %v736_v18 = vpop.permute.xlu0 %735 }
 0x228   :  { %v764_v47 = vadd.f32 %v763_v40, %v749_v39  ;;  %v639_v48 = vmax.f32 %v601_v42, 0.0  ;;  %v604_v49 = vadd.f32 %v603_v45, %v454_v57  ;;  %v731_v10 = vpop.permute.xlu1 %730 }
 0x229   :  { %v642_v62 = vmax.f32 %v612_v44, 0.0  ;;  %v753_v59 = vmul.f32 %v716_v21, %v641_v51 }
 0x22a   :  { %v751_v52 = vmul.f32 %v706_v60, %v639_v48  ;;  %v765_v53 = vadd.f32 %v764_v47, %v750_v46  ;;  %v640_v61 = vmax.f32 %v604_v49, 0.0 }
 0x22b   :  { %v754_v5 = vmul.f32 %v721_v37, %v642_v62 }
 0x22c   :  { %v766_v63 = vadd.f32 %v765_v53, %v751_v52  ;;  %v752_v0 = vmul.f32 %v711_v7, %v640_v61  ;;  %v906_v56 = vpop.f32.mrb[12].mxu1 }
 0x22d   :  { %v616_v1 = vpop.f32.mrb[13].mxu1  ;;  %v625_v3 = vadd.f32 %v906_v56, %v479_v50 }
 0x22e   :  { %v767_v55 = vadd.f32 %v766_v63, %v752_v0  ;;  %v617_v2 = vadd.f32 %v616_v1, %v469_v14  ;;  %v907_v4 = vpop.f32.mrb[14].mxu1  ;;  %v741_v14 = vpop.permute.xlu1 %740 }
 0x22f   :  { %v619_v6 = vpop.f32.mrb[15].mxu1  ;;  %v628_v9 = vadd.f32 %v907_v4, %v484_v58  ;;  %v645_v11 = vmax.f32 %v625_v3, 0.0 }
 0x230   :  { %v768_v57 = vadd.f32 %v767_v55, %v753_v59  ;;  %v643_v8 = vmax.f32 %v617_v2, 0.0  ;;  %v620_v60 = vadd.f32 %v619_v6, %v474_v32 }
 0x231   :  { %v646_v16 = vmax.f32 %v628_v9, 0.0  ;;  %v757_v19 = vmul.f32 %v736_v18, %v645_v11 }
 0x232   :  { %v755_v12 = vmul.f32 %v726_v54, %v643_v8  ;;  %v769_v13 = vadd.f32 %v768_v57, %v754_v5  ;;  %v644_v15 = vmax.f32 %v620_v60, 0.0 }
 0x233   :  { %v758_v21 = vmul.f32 %v741_v14, %v646_v16 }
 0x234   :  { %v770_v7 = vadd.f32 %v769_v13, %v755_v12  ;;  %v756_v17 = vmul.f32 %v731_v10, %v644_v15 }
 0x236   :  { %v771_v20 = vadd.f32 %v770_v7, %v756_v17 }
 0x238   :  { %v772_v22 = vadd.f32 %v771_v20, %v757_v19 }
 0x23a   :  { %v773_v23 = vadd.f32 %v772_v22, %v758_v21 }
 0x23c   :  { %v774_v24 = vrot.slane %v773_v23, 4 }
 0x23e   :  { %v775_v25 = vadd.f32 %v774_v24, %v773_v23 }
 0x240   :  { %v776_v26 = vrot.slane %v775_v25, 2 }
 0x242   :  { %v777_v27 = vadd.f32 %v776_v26, %v775_v25 }
 0x244   :  { %v778_v28 = vrot.slane %v777_v27, 1 }
 0x246   :  { %v779_v30 = vadd.f32 %v778_v28, %v777_v27 }
 0x248   :  { %v782_v31 = vadd.f32 %v781_v29, %v779_v30 }
 0x24a   :  { %783 = vst [vmem:[%s1253_s7] sm:$0x1] %v782_v31 }

</bundles_post_ra>
